<compile_context>
chip_gen: v5e
topology: v5e:2x2
jax: 0.10.0
libtpu: 0.0.40
codegen_flags: <defaults>
</compile_context>

<pallas_src>
import jax
import jax.numpy as jnp
from jax import lax
from jax.experimental import pallas as pl
from jax.experimental.pallas import tpu as pltpu


def _scorer_kernel(h_ref, e_ref, out_ref):
    """scores_tile = H_tile @ E_tile^T  (single MXU matmul, transposed-RHS contraction).

    h_ref  : [TILE_P, D]      bf16  playlist reps (mean of 2 sampled track embeddings)
    e_ref  : [TILE_N, D]      bf16  track embedding tile (scoring operand)
    out_ref: [TILE_P, TILE_N] f32   dense dot-product scores for this tile
    """
    out_ref[...] = lax.dot_general(
        h_ref[...], e_ref[...],
        dimension_numbers=(((1,), (1,)), ((), ())),   # contract over D on both sides
        preferred_element_type=jnp.float32,
    )


def _pick_tile(total, cap, align):
    """Largest multiple of `align` that divides `total` and is <= cap, else full dim."""
    t = min(cap, total)
    t = (t // align) * align
    while t >= align and total % t != 0:
        t -= align
    if t < align or total % t != 0:
        return total
    return t


def user_to_item_scores(h_play, emb, *, tile_p=None, tile_n=None):
    """Dense [P, T] playlist-track dot-product scores with one tiled pallas_call.

    h_play : [P, D] f32  playlist representations (mean of 2 sampled track embeddings)
    emb    : [T, D] f32  track embeddings
    """
    P, D = h_play.shape
    T, D2 = emb.shape
    assert D == D2

    if tile_p is None:
        cap_p = 128
        if P >= 16:
            # Keep >= 2 steps on the parallel playlist axis so both v7x TCs get work.
            cap_p = min(cap_p, P // 2)
        tile_p = _pick_tile(P, cap_p, 8)
    if tile_n is None:
        tile_n = _pick_tile(T, 512, 128)

    assert P % tile_p == 0 and T % tile_n == 0

    # bf16 MXU operands (f32 accumulation inside the kernel, f32 output).
    # TODO(synk): emit bf16 scores instead if the downstream loss tolerates it
    # (halves the dominant HBM writeback stream).
    h_bf = h_play.astype(jnp.bfloat16)
    emb_bf = emb.astype(jnp.bfloat16)

    grid = (P // tile_p, T // tile_n)

    # Cost estimate: single matmul; H re-read per track tile, E re-read per playlist tile.
    flops = 2 * P * T * D
    bytes_accessed = ((T // tile_n) * P * D * 2 +      # H bf16, re-read per N tile
                      (P // tile_p) * T * D * 2 +      # E bf16, re-read per P tile
                      P * T * 4)                       # f32 output
    cost = pl.CostEstimate(flops=int(flops), transcendentals=0,
                           bytes_accessed=int(bytes_accessed))

    # VMEM need: double-buffered H and E tiles + double-buffered output tile.
    vmem_need = 2 * (tile_p * D * 2 + tile_n * D * 2 + tile_p * tile_n * 4)
    vmem_limit = int(min(48 * 1024 * 1024, max(4 * 1024 * 1024, 4 * vmem_need)))

    return pl.pallas_call(
        _scorer_kernel,
        out_shape=jax.ShapeDtypeStruct((P, T), jnp.float32),
        grid_spec=pltpu.PrefetchScalarGridSpec(
            num_scalar_prefetch=0,
            grid=grid,
            in_specs=[
                pl.BlockSpec((tile_p, D), lambda i, j: (i, 0)),   # H tile
                pl.BlockSpec((tile_n, D), lambda i, j: (j, 0)),   # E tile (scoring RHS)
            ],
            out_specs=pl.BlockSpec((tile_p, tile_n), lambda i, j: (i, j)),
        ),
        compiler_params=pltpu.CompilerParams(
            dimension_semantics=("parallel", "parallel"),
            vmem_limit_bytes=vmem_limit,
        ),
        cost_estimate=cost,
    )(h_bf, emb_bf)


if __name__ == "__main__":
    # Small demo graph: 32 playlists, 256 tracks, 32-dim track embeddings.
    P, T, D = 32, 256, 32
    key = jax.random.PRNGKey(0)
    k_emb, k_adj, k_s0, k_s1 = jax.random.split(key, 4)

    # Track embeddings (g.nodes['track'].data['emb']).
    emb = jax.random.normal(k_emb, (T, D), jnp.float32)

    # 'contains' adjacency (playlist -> track); guarantee >= 2 tracks per playlist.
    contain = jax.random.uniform(k_adj, (P, T)) < 0.08
    contain = contain.at[:, 0].set(True).at[:, 1].set(True)

    # Module: np.random.choice(track_edges, 2) per playlist (with replacement)
    # == two independent uniform draws over that playlist's contained tracks.
    # TODO(synk): sampling done in the wrapper with jax.random, not in-kernel PRNG.
    r0 = jnp.where(contain, jax.random.uniform(k_s0, (P, T)), -1.0)
    r1 = jnp.where(contain, jax.random.uniform(k_s1, (P, T)), -1.0)
    idx0 = jnp.argmax(r0, axis=1)
    idx1 = jnp.argmax(r1, axis=1)

    # Playlist reps: mean of the 2 sampled track embeddings (2-row gather, no dense S).
    h_play = 0.5 * (emb[idx0] + emb[idx1])

    # Kernel: dense per-(playlist, track) dot-product scores.
    scores_dense = jax.block_until_ready(user_to_item_scores(h_play, emb))

    # Per-edge scores for the ('playlist','contains','track') edges (gather in wrapper).
    edge_p, edge_t = jnp.nonzero(contain)
    pair_score = jax.block_until_ready(scores_dense[edge_p, edge_t])

    # Pure-JAX fp32 reference (matches the PyTorch/DGL forward).
    ref = (h_play @ emb.T)[edge_p, edge_t]

    assert pair_score.shape == edge_p.shape
    assert bool(jnp.all(jnp.isfinite(pair_score)))
    max_err = float(jnp.max(jnp.abs(pair_score - ref)))
    # Single bf16 MXU matmul with f32 accumulation => small deviation vs fp32 reference.
    assert max_err < 0.25, max_err
    print("KERNEL_OK")
</pallas_src>

<mosaic_0001>
module attributes {stable_mosaic.version = 11 : i64} {
  func.func @_scorer_kernel(%arg0: i32, %arg1: i32, %arg2: memref<16x32xbf16, #tpu.memory_space<vmem>>, %arg3: memref<256x32xbf16, #tpu.memory_space<vmem>>, %arg4: memref<16x256xf32, #tpu.memory_space<vmem>>) attributes {dimension_semantics = [#tpu.dimension_semantics<parallel>, #tpu.dimension_semantics<parallel>], iteration_bounds = array<i64: 2, 1>, scalar_prefetch = 0 : i64, scratch_operands = 0 : i64, tpu.core_type = #tpu.core_type<tc>, window_params = [{transform_indices = @transform_0, window_bounds = array<i64: 16, 32>}, {transform_indices = @transform_1, window_bounds = array<i64: 256, 32>}, {transform_indices = @transform_2, window_bounds = array<i64: 16, 256>}]} {
    %c0 = arith.constant 0 : index
    %c0_0 = arith.constant 0 : index
    %0 = vector.load %arg2[%c0, %c0_0] : memref<16x32xbf16, #tpu.memory_space<vmem>>, vector<16x32xbf16>
    %c0_1 = arith.constant 0 : index
    %c0_2 = arith.constant 0 : index
    %1 = vector.load %arg3[%c0_1, %c0_2] : memref<256x32xbf16, #tpu.memory_space<vmem>>, vector<256x32xbf16>
    %cst = arith.constant dense<0.000000e+00> : vector<16x256xf32>
    %2 = tpu.matmul %0, %1, %cst {dimension_numbers = #tpu.dot_dimension_numbers<[1], [1], [0], [0], [0, 0, 1, 0], [], []>} : vector<16x32xbf16>, vector<256x32xbf16>, vector<16x256xf32> -> vector<16x256xf32>
    %c0_3 = arith.constant 0 : index
    %c0_4 = arith.constant 0 : index
    %3 = vector.load %arg4[%c0_3, %c0_4] : memref<16x256xf32, #tpu.memory_space<vmem>>, vector<16x256xf32>
    tpu.vector_store %arg4[%c0_3, %c0_4], %2 {strides = array<i32>} : memref<16x256xf32, #tpu.memory_space<vmem>>, vector<16x256xf32>,
    return
  }
  func.func @transform_0(%arg0: i32, %arg1: i32) -> (i32, i32) {
    %c0_i32 = arith.constant 0 : i32
    %c0_i32_0 = arith.constant 0 : i32
    return %arg0, %c0_i32 : i32, i32
  }
  func.func @transform_1(%arg0: i32, %arg1: i32) -> (i32, i32) {
    %c0_i32 = arith.constant 0 : i32
    %c0_i32_0 = arith.constant 0 : i32
    return %arg1, %c0_i32 : i32, i32
  }
  func.func @transform_2(%arg0: i32, %arg1: i32) -> (i32, i32) {
    %c0_i32 = arith.constant 0 : i32
    return %arg0, %arg1 : i32, i32
  }
}

</mosaic_0001>

<bundles_post_ra>
// kernel: tpu_custom_call.1
= control target key start
LH: loop header
LB: loop body
LE: loop exit
PB: predicated region body
PF: predicated region fallthrough
CT: control target
= control target key end

     0   :  { %7 = vsyncpa [#allocation3], 0  ;;  %s912_s0 = inlined_call_operand.vmem [shape: bf16[32,32], index: 0, kind: input, shape index: {}]   ;;  %s913_s1 = inlined_call_operand.vmem [shape: bf16[256,32], index: 1, kind: input, shape index: {}]   ;;  %s914_s2 = inlined_call_operand.hbm [shape: f32[32,256], index: 2, kind: output, shape index: {}]  }
   0x1   :  { %9 = vsyncpa [#allocation3 + $0x1], 0  ;;  %s750_s9 = smov 0   ;;  %s752_s10 = smov 0  }
   0x2   :  { %s754_s11 = smov 0   ;;  %s756_s12 = smov 0  }
   0x3   :  { %s758_s13 = smov 0   ;;  %s760_s14 = smov 0  }
   0x4 LB: > { %s492_s15 = sadd.s32 4294967295, %s731_s14   ;;  %s493_s16 = sadd.s32 4294967294, %s731_s14   ;;  %s731_s14 = sphi %s760_s14, %s15_s14   ;;  %s727_s13 = sphi %s758_s13, %s921_s13   ;;  %s723_s12 = sphi %s756_s12, %s920_s12   ;;  %s719_s11 = sphi %s754_s11, %s919_s11   ;;  %s715_s10 = sphi %s752_s10, %s918_s10   ;;  %s711_s9 = sphi %s750_s9, %s917_s9  }
   0x5   : > { %s27_s17 = sadd.s32 1, %s727_s13  ;;  %s88_s18 = sadd.s32 1, %s719_s11 }
   0x6   : > { %p29_p0 = scmp.ge.s32.totalorder %s27_s17, 2  ;;  %p98_p1 = scmp.ne.s32.totalorder %s719_s11, %s715_s10 }
   0x7   : > { %p99_p2 = scmp.eq.s32.totalorder %s492_s15, 1  ;;  %p104_p3 = scmp.ne.s32.totalorder %s715_s10, %s711_s9 }
   0x8   : > { %s923_s17 = smov (%p29_p0, %s27_s17), 0  ;;  %p105_p5 = scmp.eq.s32.totalorder %s493_s16, 1 }
   0x9   : > { %p790_p4 = por %p99_p2, %p98_p1  ;;  %s83_s20 = ssub.s32 %s727_s13, %s923_s17 }
   0xa   : > { %p497_p6 = scmp.ge.s32.totalorder %s731_s14, 1  ;;  %p86_p7 = scmp.eq.s32.totalorder %s83_s20, 0 }
   0xb   : > { %p797_p8 = por %p105_p5, %p104_p3  ;;  %p141_p9 = scmp.lt.s32.totalorder %s731_s14, 3 }
   0xc   : > { %s803_s22 = scalar_select %p86_p7, %s719_s11, %s88_s18  }
   0xd   : > { %p142_p10 = pnand %p497_p6, %p141_p9 }
   0xe   : > { %s499_s5 = sshll.u32 (!%p142_p10), %s723_s12, 1  ;;  %s165_s24 = sand.u32 (!%p142_p10), 1, %s715_s10  }
   0xf   : > { %145 = sbr.rel (%p142_p10) target bundleno = 224 (0xe0), region = 28  ;;  %p169_p11 = scmp.lt.s32.totalorder (!%p142_p10), %s499_s5, 3 }
  0x10   : > { %s498_s25 = sshll.u32 (!%p142_p10), %s165_s24, 5  ;;  %s595_s26 = sshll.u32 (!%p142_p10), %s723_s12, 5 }
  0x11   : > { %s167_s27 = scalar_lea.vmem (!%p142_p10), [#allocation2], %s498_s25  ;;  %s400_s30 = scalar_lea.hbm (!%p142_p10), %s914_s2, %s595_s26 }
  0x12   : > { %s401_s3 = sshll.u32 (!%p142_p10), %s167_s27, 4  ;;  %s403_s4 = sshll.u32 (!%p142_p10), %s400_s30, 4  ;;  %s402_s3 = int_to_ptr.vmem [resolvable:$true] %s401_s3  ;;  %s404_s4 = int_to_ptr.hbm [resolvable:$true] %s403_s4 }
  0x13   : > { %s667_s12 = sshra.s32 (!%p142_p10), %s404_s4, 4  ;;  %s673_s15 = scalar_lea.hbm (!%p142_p10), %s914_s2, 64  ;;  %s668_s12 = int_to_ptr.hbm [resolvable:$true] %s667_s12 }
  0x14   : > { %v585_v0 = vld [vmem:[%s913_s1 + $0x38] sm:$0xff]  ;;  %vm301_vm0 = vcmask 261120   ;;  %v584_v4 = vld [vmem:[%s913_s1 + $0x30] sm:$0xff]  ;;  %v583_v8 = vld [vmem:[%s913_s1 + $0x28] sm:$0xff]  ;;  %s925_s5 = smov (!%p169_p11, %s499_s5), 3  ;;  %s669_s6 = scalar_lea.hbm %s668_s12, 32 }
  0x15   : > { %v593_v1 = vld [vmem:[%s913_s1 + $0x78] sm:$0xff]  ;;  %v327_v2 = vsel %vm301_vm0, %v585_v0, 0  ;;  %v592_v5 = vld [vmem:[%s913_s1 + $0x70] sm:$0xff]  ;;  %v324_v6 = vsel %vm301_vm0, %v584_v4, 0  ;;  %v591_v9 = vld [vmem:[%s913_s1 + $0x68] sm:$0xff]  ;;  %v321_v10 = vsel %vm301_vm0, %v583_v8, 0  ;;  %p670_p12 = scmp.ne.s32.totalorder %s668_s12, %s669_s6  ;;  %p674_p1 = scmp.lt.s32.totalorder %s668_s12, %s914_s2 }
  0x16   : > { %v351_v3 = vsel %vm301_vm0, %v593_v1, 0  ;;  %353 = vmatpush.bf16.xpose.msra.mxu0 %v327_v2  ;;  %v348_v7 = vsel %vm301_vm0, %v592_v5, 0  ;;  %v345_v11 = vsel %vm301_vm0, %v591_v9, 0  ;;  %v582_v12 = vld [vmem:[%s913_s1 + $0x20] sm:$0xff]  ;;  %v581_v16 = vld [vmem:[%s913_s1 + $0x18] sm:$0xff]  ;;  %v580_v20 = vld [vmem:[%s913_s1 + $0x10] sm:$0xff]  ;;  %p675_p2 = scmp.lt.s32.totalorder %s673_s15, %s669_s6 }
  0x17   : > { %367 = vmatpush.bf16.xpose.msra.mxu1 %v351_v3  ;;  %v590_v13 = vld [vmem:[%s913_s1 + $0x60] sm:$0xff]  ;;  %v318_v14 = vsel %vm301_vm0, %v582_v12, 0  ;;  %v589_v17 = vld [vmem:[%s913_s1 + $0x58] sm:$0xff]  ;;  %v315_v18 = vsel %vm301_vm0, %v581_v16, 0  ;;  %v588_v21 = vld [vmem:[%s913_s1 + $0x50] sm:$0xff]  ;;  %v312_v22 = vsel %vm301_vm0, %v580_v20, 0  ;;  %p671_p13 = pnand %p670_p12, %p790_p4 }
  0x18   : > { %v342_v15 = vsel %vm301_vm0, %v590_v13, 0  ;;  %v339_v19 = vsel %vm301_vm0, %v589_v17, 0  ;;  %v336_v23 = vsel %vm301_vm0, %v588_v21, 0  ;;  %v579_v24 = vld [vmem:[%s913_s1 + $0x8] sm:$0xff]  ;;  %v578_v28 = vld [vmem:[%s913_s1] sm:$0xff]  ;;  %s500_s16 = sshll.u32 %s925_s5, 2  ;;  %p676_p3 = por %p675_p2, %p674_p1 }
  0x19   : > { %v587_v25 = vld [vmem:[%s913_s1 + $0x48] sm:$0xff]  ;;  %v309_v26 = vsel %vm301_vm0, %v579_v24, 0  ;;  %v586_v29 = vld [vmem:[%s913_s1 + $0x40] sm:$0xff]  ;;  %v306_v30 = vsel %vm301_vm0, %v578_v28, 0  ;;  %s172_s23 = scalar_lea.vmem %s912_s0, %s500_s16  ;;  %s386_s5 = scalar_lea.sflag [#allocation3], %s165_s24 }
  0x1a   : > { %v333_v27 = vsel %vm301_vm0, %v587_v25, 0  ;;  %v330_v31 = vsel %vm301_vm0, %v586_v29, 0  ;;  %v577_v32 = vld [vmem:[%s172_s23] sm:$0xff]  ;;  %p672_p0 = pneg %p671_p13 }
  0x1c   : > { %p677_p5 = pnand %p676_p3, %p672_p0 }
  0x1e   : > { %354 = vmatpush.bf16.xpose.msra.mxu0 %v324_v6 }
  0x1f   : > { %368 = vmatpush.bf16.xpose.msra.mxu1 %v348_v7 }
  0x26   : > { %355 = vmatpush.bf16.xpose.msra.mxu0 %v321_v10 }
  0x27   : > { %369 = vmatpush.bf16.xpose.msra.mxu1 %v345_v11 }
  0x2e   : > { %356 = vmatpush.bf16.xpose.msra.mxu0 %v318_v14 }
  0x2f   : > { %370 = vmatpush.bf16.xpose.msra.mxu1 %v342_v15 }
  0x36   : > { %357 = vmatpush.bf16.xpose.msra.mxu0 %v315_v18 }
  0x37   : > { %371 = vmatpush.bf16.xpose.msra.mxu1 %v339_v19 }
  0x3e   : > { %358 = vmatpush.bf16.xpose.msra.mxu0 %v312_v22 }
  0x3f   : > { %372 = vmatpush.bf16.xpose.msra.mxu1 %v336_v23 }
  0x46   : > { %359 = vmatpush.bf16.xpose.msra.mxu0 %v309_v26 }
  0x47   : > { %373 = vmatpush.bf16.xpose.msra.mxu1 %v333_v27 }
  0x4e   : > { %360 = vmatpush.bf16.xpose.msra.mxu0 %v306_v30 }
  0x4f   : > { %374 = vmatpush.bf16.xpose.msra.mxu1 %v330_v31 }
  0x55   : > { %569 = vmatmul.msk.bf16.vlgmr.msra.gmra.mxu0 %vm301_vm0, %v577_v32 }
  0x56   : > { %570 = vmatmul.msk.bf16.vlgmr.msra.gmra.mxu1 %vm301_vm0, %v577_v32 }
  0xd2   : > { %v362_v33 = vpop.f32.mrf.mxu0 }
  0xd3   : > { %v376_v34 = vpop.f32.mrf.mxu1  ;;  %381 = vst [vmem:[%s167_s27] sm:$0xff] %v362_v33 }
  0xd4   : > { %382 = vst [vmem:[%s167_s27 + $0x8] sm:$0xff] %v376_v34 }
  0xda   : > { %v364_v35 = vpop.f32.mrf.mxu0 }
  0xdb   : > { %v378_v36 = vpop.f32.mrf.mxu1  ;;  %383 = vst [vmem:[%s167_s27 + $0x10] sm:$0xff] %v364_v35 }
  0xdc   : > { %384 = vst [vmem:[%s167_s27 + $0x18] sm:$0xff] %v378_v36 }
  0xdd   : > { %680 = shalt.err (!%p677_p5)
}
  0xde   : > { %s733_s20 = smov 256   ;;  %s734_s23 = smov 16  }
  0xdf   : > { %596 = dma.vmem_to_hbm [thread:$0]  (%p790_p4), %s402_s3, 512, %s404_s4, %s386_s5, %s733_s20, %s733_s20, %s734_s23  }
  0xe0 PF: > { %p602_p6 = scmp.ge.s32.totalorder %s731_s14, 2  ;;  %s418_s24 = sand.u32 1, %s711_s9  }
  0xe1   : > { %s419_s25 = scalar_lea.sflag [#allocation3], %s418_s24 }
  0xe2   : > { %p599_p7 = pnand %p602_p6, %p797_p8 }
  0xe4   : > { %p600_p9 = pneg %p599_p7 }
  0xe6   : > { %706 = dma.done.wait (%p600_p9), %s419_s25, 512  }
  0xe7   : > { %708 = vsyncadd (%p600_p9), %s419_s25, 4294966784  ;;  %s15_s14 = sadd.s32 1, %s731_s14   ;;  %s917_s9 = smov %s715_s10 }
  0xe8   : > { %p12_p10 = scmp.ge.s32.totalorder %s15_s14, 4   ;;  %s918_s10 = smov %s719_s11 }
  0xe9   : > { %s919_s11 = smov %s803_s22  ;;  %s920_s12 = smov %s727_s13 }
  0xea   : > { %s921_s13 = smov %s923_s17  ;;  %14 = sbr.rel (!%p12_p10) target bundleno = 4 (0x4), region = 66 }
  0xef   :  { %425 = vsyncpa [#allocation3], 1 }
  0xf0   :  { %427 = vsyncpa [#allocation3 + $0x1], 1 }

</bundles_post_ra>
